<compile_context>
chip_gen: v7x
topology: tpu7x:2x2x1
jax: 0.10.0
libtpu: 0.0.40
codegen_flags: <defaults>
</compile_context>

<pallas_src>
import jax
import jax.numpy as jnp
from jax import lax
from jax.experimental import pallas as pl
from jax.experimental.pallas import tpu as pltpu

PID_DIM = 6
H1, H2, H3, H4 = 64, 128, 128, 32

# Fused layer-1 weight slab: rows 0:64 = W1, row 64 = residual wr, rows 65:71 = 0.
W1_ROWS = 72
RES_ROW = H1

# Packed bf16 weight slab for layers 2..4 (row offsets, 128-lane wide).
OFF_W2 = 0
OFF_W3 = OFF_W2 + H2          # 128
OFF_W4 = OFF_W3 + H3          # 256
W_ROWS = OFF_W4 + H4          # 288
W_COLS = 128

FLOPS_PER_ROW = 2 * (PID_DIM * (H1 + 1) + H1 * H2 + H2 * H3 + H3 * H4 + H4)


def critic_kernel(x_ref, w1_ref, w_ref, b_ref, o_ref):
    # x_ref : (TB, 6)     f32  streamed batch tile, natural layout
    # w1_ref: (72, 6)     f32  resident  [W1 ; wr]          (layer 1 + residual)
    # w_ref : (288, 128)  bf16 resident  [W2 ; W3 ; W4]
    # b_ref : (128, 8)    f32  resident  biases / head weight column / head bias
    # o_ref : (1, TB)     f32  lane-dense output row
    x = x_ref[...]                                                    # (TB, 6) f32

    # Fused layer 1 + residual in f32 (full-precision residual path).  Contracting
    # the last axes of both operands puts the batch on the lane axis of the result.
    y1 = lax.dot_general(w1_ref[...], x, (((1,), (1,)), ((), ())),
                         preferred_element_type=jnp.float32)          # (72, TB)
    res = y1[RES_ROW:RES_ROW + 1, :]                                  # (1, TB) no ReLU
    h = jnp.maximum(y1[0:H1, :] + b_ref[0:H1, 0:1], 0.0)              # (64, TB) f32
    h = h.astype(jnp.bfloat16)

    def dense_relu(h_bf16, off, out_dim, k, bias_col):
        w = w_ref[off:off + out_dim, 0:k]                             # (out, k) bf16
        y = jnp.dot(w, h_bf16, preferred_element_type=jnp.float32)
        return jnp.maximum(y + b_ref[0:out_dim, bias_col:bias_col + 1], 0.0)

    h = dense_relu(h, OFF_W2, H2, H1, 1).astype(jnp.bfloat16)         # (128, TB)
    h = dense_relu(h, OFF_W3, H3, H2, 2).astype(jnp.bfloat16)         # (128, TB)
    h4 = dense_relu(h, OFF_W4, H4, H3, 3)                             # (32, TB) f32

    # Head off the MXU: VPU broadcast-multiply + XLU sublane reduction.
    w5_col = b_ref[0:H4, 4:5]                                         # (32, 1) f32
    head = jnp.sum(h4 * w5_col, axis=0, keepdims=True)                # (1, TB)
    out = head + res + b_ref[0:1, 5:6]                                # + (b5 + br)
    o_ref[...] = out.astype(o_ref.dtype)


def _round_up(n, m):
    return ((n + m - 1) // m) * m


def _pick_tile(batch, tb):
    """Effective batch tile.  For B >= 256, cap so grid >= 2 (v7x megacore split)
    and keep the tile a multiple of 128 (lane-dense output blocks).  Otherwise a
    single full-array tile (block == array dims is always layout-legal)."""
    if batch >= 256:
        half = _round_up(pl.cdiv(batch, 2), 128)
        return max(128, min(tb, half, (batch // 128) * 128))
    return batch


def critic_forward(x, w1buf, wbuf, bbuf, *, tb=4096):
    """x: (B, PID_DIM) f32, natural layout.  Returns (B, 1) f32."""
    batch = x.shape[0]
    tb_eff = _pick_tile(batch, tb)
    grid = pl.cdiv(batch, tb_eff)

    out = pl.pallas_call(
        critic_kernel,
        out_shape=jax.ShapeDtypeStruct((1, batch), jnp.float32),
        grid=(grid,),
        in_specs=[
            pl.BlockSpec((tb_eff, PID_DIM), lambda i: (i, 0)),   # streamed batch tile
            # Resident parameters: constant index_maps -> DMA'd once, kept in VMEM.
            pl.BlockSpec(w1buf.shape, lambda i: (0, 0)),
            pl.BlockSpec(wbuf.shape, lambda i: (0, 0)),
            pl.BlockSpec(bbuf.shape, lambda i: (0, 0)),
        ],
        out_specs=pl.BlockSpec((1, tb_eff), lambda i: (0, i)),
        compiler_params=pltpu.CompilerParams(
            dimension_semantics=("parallel",),          # megacore split on v7x
            vmem_limit_bytes=32 * 1024 * 1024,          # explicit (v5e default is 16 MiB)
        ),
        cost_estimate=pl.CostEstimate(
            flops=FLOPS_PER_ROW * batch,
            transcendentals=0,
            bytes_accessed=(x.size * 4 + batch * 4 + w1buf.size * 4
                            + wbuf.size * 2 + bbuf.size * 4),
        ),
    )(x, w1buf, wbuf, bbuf)

    return out.reshape(batch, 1)


def init_params(key, pid_dim=PID_DIM):
    """PyTorch nn.Linear default init U(+-1/sqrt(fan_in)); weights stored
    PyTorch-style as (out_features, in_features), biases as (out_features,)."""
    dims = [pid_dim, H1, H2, H3, H4, 1]
    keys = jax.random.split(key, 2 * len(dims))
    params = []
    ki = 0
    for i in range(5):
        fan_in, fan_out = dims[i], dims[i + 1]
        bound = 1.0 / float(fan_in) ** 0.5
        w = jax.random.uniform(keys[ki], (fan_out, fan_in), jnp.float32, -bound, bound)
        b = jax.random.uniform(keys[ki + 1], (fan_out,), jnp.float32, -bound, bound)
        params += [w, b]
        ki += 2
    bound = 1.0 / float(pid_dim) ** 0.5
    wr = jax.random.uniform(keys[ki], (1, pid_dim), jnp.float32, -bound, bound)
    br = jax.random.uniform(keys[ki + 1], (1,), jnp.float32, -bound, bound)
    params += [wr, br]
    return params


def pack_params(params):
    """Pack the 12 parameter arrays into (w1buf f32, wbuf bf16, bbuf f32). Done once."""
    w1, b1, w2, b2, w3, b3, w4, b4, w5, b5, wr, br = params

    # Layer-1 weight fused with the residual weight (row 64); stays f32.
    w1buf = jnp.zeros((W1_ROWS, PID_DIM), jnp.float32)
    w1buf = w1buf.at[:H1].set(w1)
    w1buf = w1buf.at[RES_ROW].set(wr[0])

    # Layers 2..4 weights, bf16 MXU operands.
    wbuf = jnp.zeros((W_ROWS, W_COLS), jnp.float32)
    wbuf = wbuf.at[OFF_W2:OFF_W2 + H2, :H1].set(w2)
    wbuf = wbuf.at[OFF_W3:OFF_W3 + H3, :H2].set(w3)
    wbuf = wbuf.at[OFF_W4:OFF_W4 + H4, :H3].set(w4)
    wbuf = wbuf.astype(jnp.bfloat16)

    # Biases, the head weight as a lane-broadcastable column, fused head bias.
    bbuf = jnp.zeros((128, 8), jnp.float32)
    bbuf = bbuf.at[:H1, 0].set(b1)
    bbuf = bbuf.at[:H2, 1].set(b2)
    bbuf = bbuf.at[:H3, 2].set(b3)
    bbuf = bbuf.at[:H4, 3].set(b4)
    bbuf = bbuf.at[:H4, 4].set(w5[0])                # head weights (VPU/XLU head)
    bbuf = bbuf.at[0, 5].set(b5[0] + br[0])          # fused head + residual bias
    return w1buf, wbuf, bbuf


def critic_reference(x, params, *, mirror_kernel_dtypes=False):
    """Pure-JAX reference matching the PyTorch forward.  With
    mirror_kernel_dtypes=True, layers 2-4 use bf16 operands like the kernel
    (layer 1, residual and head stay f32, as in the kernel)."""
    w1, b1, w2, b2, w3, b3, w4, b4, w5, b5, wr, br = params
    hp = jax.lax.Precision.HIGHEST

    def dense(h, w, b, bf16):
        if bf16:
            h = h.astype(jnp.bfloat16)
            w = w.astype(jnp.bfloat16)
        return jnp.dot(h, w.T, preferred_element_type=jnp.float32, precision=hp) + b

    m = mirror_kernel_dtypes
    h = jnp.maximum(dense(x, w1, b1, False), 0.0)
    h = jnp.maximum(dense(h, w2, b2, m), 0.0)
    h = jnp.maximum(dense(h, w3, b3, m), 0.0)
    h = jnp.maximum(dense(h, w4, b4, m), 0.0)
    return dense(h, w5, b5, False) + dense(x, wr, br, False)


if __name__ == "__main__":
    key = jax.random.PRNGKey(0)
    k_params, k_x1, k_x2 = jax.random.split(key, 3)
    params = init_params(k_params)
    w1buf, wbuf, bbuf = pack_params(params)

    # Small batch: single full-array tile.
    B = 16
    x = jax.random.normal(k_x1, (B, PID_DIM), dtype=jnp.float32)
    out = jax.block_until_ready(critic_forward(x, w1buf, wbuf, bbuf))
    ref_mirror = critic_reference(x, params, mirror_kernel_dtypes=True)
    ref_f32 = critic_reference(x, params, mirror_kernel_dtypes=False)
    assert out.shape == (B, 1), out.shape
    assert jnp.allclose(out, ref_mirror, atol=1e-2, rtol=1e-2), (out, ref_mirror)
    assert jnp.allclose(out, ref_f32, atol=5e-2, rtol=5e-2), (out, ref_f32)

    # Larger batch: multi-step grid (>= 2 tiles for the v7x split) + ragged last tile.
    B2 = 300
    x2 = jax.random.normal(k_x2, (B2, PID_DIM), dtype=jnp.float32)
    out2 = jax.block_until_ready(critic_forward(x2, w1buf, wbuf, bbuf))
    ref2 = critic_reference(x2, params, mirror_kernel_dtypes=False)
    assert out2.shape == (B2, 1), out2.shape
    assert jnp.allclose(out2, ref2, atol=5e-2, rtol=5e-2), (out2, ref2)

    print("KERNEL_OK")
</pallas_src>

<mosaic_0001>
module attributes {stable_mosaic.version = 11 : i64} {
  func.func @critic_kernel(%arg0: i32, %arg1: memref<16x6xf32, #tpu.memory_space<vmem>>, %arg2: memref<72x6xf32, #tpu.memory_space<vmem>>, %arg3: memref<288x128xbf16, #tpu.memory_space<vmem>>, %arg4: memref<128x8xf32, #tpu.memory_space<vmem>>, %arg5: memref<1x16xf32, #tpu.memory_space<vmem>>) attributes {dimension_semantics = [#tpu.dimension_semantics<parallel>], iteration_bounds = array<i64: 1>, scalar_prefetch = 0 : i64, scratch_operands = 0 : i64, tpu.core_type = #tpu.core_type<tc>, window_params = [{transform_indices = @transform_0, window_bounds = array<i64: 16, 6>}, {pipeline_mode = #tpu.pipeline_mode<synchronous>, transform_indices = @transform_1, window_bounds = array<i64: 72, 6>}, {pipeline_mode = #tpu.pipeline_mode<synchronous>, transform_indices = @transform_2, window_bounds = array<i64: 288, 128>}, {pipeline_mode = #tpu.pipeline_mode<synchronous>, transform_indices = @transform_3, window_bounds = array<i64: 128, 8>}, {transform_indices = @transform_4, window_bounds = array<i64: 1, 16>}]} {
    %c0 = arith.constant 0 : index
    %c0_0 = arith.constant 0 : index
    %0 = vector.load %arg1[%c0, %c0_0] : memref<16x6xf32, #tpu.memory_space<vmem>>, vector<16x6xf32>
    %c0_1 = arith.constant 0 : index
    %c0_2 = arith.constant 0 : index
    %1 = vector.load %arg2[%c0_1, %c0_2] : memref<72x6xf32, #tpu.memory_space<vmem>>, vector<72x6xf32>
    %cst = arith.constant dense<0.000000e+00> : vector<72x16xf32>
    %2 = tpu.matmul %1, %0, %cst {dimension_numbers = #tpu.dot_dimension_numbers<[1], [1], [0], [0], [0, 0, 1, 0], [], []>} : vector<72x6xf32>, vector<16x6xf32>, vector<72x16xf32> -> vector<72x16xf32>
    %3 = vector.extract_strided_slice %2 {offsets = [64, 0], sizes = [1, 16], strides = [1, 1]} : vector<72x16xf32> to vector<1x16xf32>
    %4 = vector.extract_strided_slice %2 {offsets = [0, 0], sizes = [64, 16], strides = [1, 1]} : vector<72x16xf32> to vector<64x16xf32>
    %c0_3 = arith.constant 0 : index
    %c0_4 = arith.constant 0 : index
    %5 = vector.load %arg4[%c0_3, %c0_4] : memref<128x8xf32, #tpu.memory_space<vmem>>, vector<64x1xf32>
    %6 = vector.broadcast %5 : vector<64x1xf32> to vector<64x16xf32>
    %7 = arith.addf %4, %6 : vector<64x16xf32>
    %cst_5 = arith.constant 0.000000e+00 : f32
    %8 = vector.broadcast %cst_5 : f32 to vector<64x16xf32>
    %9 = arith.maximumf %7, %8 : vector<64x16xf32>
    %10 = arith.truncf %9 : vector<64x16xf32> to vector<64x16xbf16>
    %c0_6 = arith.constant 0 : index
    %c0_7 = arith.constant 0 : index
    %11 = vector.load %arg3[%c0_6, %c0_7] : memref<288x128xbf16, #tpu.memory_space<vmem>>, vector<128x64xbf16>
    %cst_8 = arith.constant dense<0.000000e+00> : vector<128x16xf32>
    %12 = tpu.matmul %11, %10, %cst_8 {dimension_numbers = #tpu.dot_dimension_numbers<[1], [0], [0], [1], [0, 0, 1, 1], [], []>} : vector<128x64xbf16>, vector<64x16xbf16>, vector<128x16xf32> -> vector<128x16xf32>
    %c0_9 = arith.constant 0 : index
    %c1 = arith.constant 1 : index
    %13 = vector.load %arg4[%c0_9, %c1] : memref<128x8xf32, #tpu.memory_space<vmem>>, vector<128x1xf32>
    %14 = vector.broadcast %13 : vector<128x1xf32> to vector<128x16xf32>
    %15 = arith.addf %12, %14 : vector<128x16xf32>
    %cst_10 = arith.constant 0.000000e+00 : f32
    %16 = vector.broadcast %cst_10 : f32 to vector<128x16xf32>
    %17 = arith.maximumf %15, %16 : vector<128x16xf32>
    %18 = arith.truncf %17 : vector<128x16xf32> to vector<128x16xbf16>
    %c128 = arith.constant 128 : index
    %c0_11 = arith.constant 0 : index
    %19 = vector.load %arg3[%c128, %c0_11] : memref<288x128xbf16, #tpu.memory_space<vmem>>, vector<128x128xbf16>
    %cst_12 = arith.constant dense<0.000000e+00> : vector<128x16xf32>
    %20 = tpu.matmul %19, %18, %cst_12 {dimension_numbers = #tpu.dot_dimension_numbers<[1], [0], [0], [1], [0, 0, 1, 1], [], []>} : vector<128x128xbf16>, vector<128x16xbf16>, vector<128x16xf32> -> vector<128x16xf32>
    %c0_13 = arith.constant 0 : index
    %c2 = arith.constant 2 : index
    %21 = vector.load %arg4[%c0_13, %c2] : memref<128x8xf32, #tpu.memory_space<vmem>>, vector<128x1xf32>
    %22 = vector.broadcast %21 : vector<128x1xf32> to vector<128x16xf32>
    %23 = arith.addf %20, %22 : vector<128x16xf32>
    %cst_14 = arith.constant 0.000000e+00 : f32
    %24 = vector.broadcast %cst_14 : f32 to vector<128x16xf32>
    %25 = arith.maximumf %23, %24 : vector<128x16xf32>
    %26 = arith.truncf %25 : vector<128x16xf32> to vector<128x16xbf16>
    %c256 = arith.constant 256 : index
    %c0_15 = arith.constant 0 : index
    %27 = vector.load %arg3[%c256, %c0_15] : memref<288x128xbf16, #tpu.memory_space<vmem>>, vector<32x128xbf16>
    %cst_16 = arith.constant dense<0.000000e+00> : vector<32x16xf32>
    %28 = tpu.matmul %27, %26, %cst_16 {dimension_numbers = #tpu.dot_dimension_numbers<[1], [0], [0], [1], [0, 0, 1, 1], [], []>} : vector<32x128xbf16>, vector<128x16xbf16>, vector<32x16xf32> -> vector<32x16xf32>
    %c0_17 = arith.constant 0 : index
    %c3 = arith.constant 3 : index
    %29 = vector.load %arg4[%c0_17, %c3] : memref<128x8xf32, #tpu.memory_space<vmem>>, vector<32x1xf32>
    %30 = vector.broadcast %29 : vector<32x1xf32> to vector<32x16xf32>
    %31 = arith.addf %28, %30 : vector<32x16xf32>
    %cst_18 = arith.constant 0.000000e+00 : f32
    %32 = vector.broadcast %cst_18 : f32 to vector<32x16xf32>
    %33 = arith.maximumf %31, %32 : vector<32x16xf32>
    %c0_19 = arith.constant 0 : index
    %c4 = arith.constant 4 : index
    %34 = vector.load %arg4[%c0_19, %c4] : memref<128x8xf32, #tpu.memory_space<vmem>>, vector<32x1xf32>
    %35 = vector.broadcast %34 : vector<32x1xf32> to vector<32x16xf32>
    %36 = arith.mulf %33, %35 : vector<32x16xf32>
    %cst_20 = arith.constant dense<0.000000e+00> : vector<16xf32>
    %37 = vector.multi_reduction <add>, %36, %cst_20 [0] : vector<32x16xf32> to vector<16xf32>
    %38 = vector.shape_cast %37 : vector<16xf32> to vector<1x16xf32>
    %39 = arith.addf %38, %3 : vector<1x16xf32>
    %c0_21 = arith.constant 0 : index
    %c5 = arith.constant 5 : index
    %40 = vector.load %arg4[%c0_21, %c5] : memref<128x8xf32, #tpu.memory_space<vmem>>, vector<1x1xf32>
    %41 = vector.broadcast %40 : vector<1x1xf32> to vector<1x16xf32>
    %42 = arith.addf %39, %41 : vector<1x16xf32>
    %c0_22 = arith.constant 0 : index
    %c0_23 = arith.constant 0 : index
    %43 = vector.load %arg5[%c0_22, %c0_23] : memref<1x16xf32, #tpu.memory_space<vmem>>, vector<1x16xf32>
    tpu.vector_store %arg5[%c0_22, %c0_23], %42 {strides = array<i32>} : memref<1x16xf32, #tpu.memory_space<vmem>>, vector<1x16xf32>,
    return
  }
  func.func @transform_0(%arg0: i32) -> (i32, i32) {
    %c0_i32 = arith.constant 0 : i32
    %c0_i32_0 = arith.constant 0 : i32
    return %arg0, %c0_i32 : i32, i32
  }
  func.func @transform_1(%arg0: i32) -> (i32, i32) {
    %c0_i32 = arith.constant 0 : i32
    %c0_i32_0 = arith.constant 0 : i32
    %c0_i32_1 = arith.constant 0 : i32
    return %c0_i32, %c0_i32_0 : i32, i32
  }
  func.func @transform_2(%arg0: i32) -> (i32, i32) {
    %c0_i32 = arith.constant 0 : i32
    %c0_i32_0 = arith.constant 0 : i32
    %c0_i32_1 = arith.constant 0 : i32
    return %c0_i32, %c0_i32_0 : i32, i32
  }
  func.func @transform_3(%arg0: i32) -> (i32, i32) {
    %c0_i32 = arith.constant 0 : i32
    %c0_i32_0 = arith.constant 0 : i32
    %c0_i32_1 = arith.constant 0 : i32
    return %c0_i32, %c0_i32_0 : i32, i32
  }
  func.func @transform_4(%arg0: i32) -> (i32, i32) {
    %c0_i32 = arith.constant 0 : i32
    %c0_i32_0 = arith.constant 0 : i32
    return %c0_i32, %arg0 : i32, i32
  }
}

</mosaic_0001>

<bundles_post_ra>
// kernel: tpu_custom_call.1
= control target key start
LH: loop header
LB: loop body
LE: loop exit
PB: predicated region body
PF: predicated region fallthrough
CT: control target
= control target key end

     0   :  { %vm30_vm0 = vcmask 48128   ;;  %v1202_v2 = vmov 0.0|0.0   ;;  %vm1203_vm2 = vmmov 0   ;;  %v1204_v4 = vmov 0.0   ;;  %s1498_s0 = inlined_call_operand.vmem [shape: f32[16,6], index: 0, kind: input, shape index: {}]   ;;  %s1499_s1 = inlined_call_operand.vmem [shape: f32[72,6], index: 1, kind: input, shape index: {}]   ;;  %s1500_s2 = inlined_call_operand.vmem [shape: bf16[288,128], index: 2, kind: input, shape index: {}]   ;;  %s1501_s3 = inlined_call_operand.vmem [shape: f32[128,8], index: 3, kind: input, shape index: {}]   ;;  %s1502_s4 = inlined_call_operand.hbm [shape: f32[1,16], index: 4, kind: output, shape index: {}]  }
   0x1   :  { %v19_v0 = vld [vmem:[%s1498_s0] sm:$0xff]  ;;  %v20_v1 = vld [vmem:[%s1498_s0 + $0x8] sm:$0xff]  ;;  %1133 = vmatprep.subr.bf16.mxu0 %v1202_v2  ;;  %vm1135_vm1 = vmpackc.low %vm30_vm0, %vm30_vm0  ;;  %1030 = vmatprep.mubr.msk.f32.mxu0 %vm1203_vm2, %v1204_v4  ;;  %v1205_v5 = vmov 0  }
   0x2   :  { %v1134_v3 = vpack.c.bf16 %v20_v1, %v19_v0  ;;  %1149 = vset.pattern.permute.xlu0 %v1205_v5  ;;  %1150 = vset.pattern.permute.xlu1 %v1205_v5  ;;  %v1249_v6 = vld [vmem:[%s1501_s3] sm:$0xff]  ;;  %v1254_v7 = vld [vmem:[%s1501_s3 + $0x10] sm:$0xff]  ;;  %v1265_v9 = vld [vmem:[%s1501_s3 + $0x8] sm:$0xff] }
   0x3   :  { %1137 = vmatprep.subr.bf16.mxu1 %v1202_v2  ;;  %1054 = vmatprep.mubr.msk.f32.mxu1 %vm1203_vm2, %v1204_v4  ;;  %v21_v8 = vld [vmem:[%s1499_s1] sm:$0xff]  ;;  %v1270_v10 = vld [vmem:[%s1501_s3 + $0x18] sm:$0xff]  ;;  %v1280_v12 = vld [vmem:[%s1501_s3 + $0x28] sm:$0xff] }
   0x4   :  { %1136 = vmatpush3.bf16.xpose.msk.msra.mxu0 %vm1135_vm1, %v1134_v3  ;;  %1138 = vmatpush3.bf16.xpose.msk.msra.mxu1 %vm1135_vm1, %v1134_v3  ;;  %v1275_v11 = vld [vmem:[%s1501_s3 + $0x20] sm:$0xff]  ;;  %v22_v13 = vld [vmem:[%s1499_s1 + $0x8] sm:$0xff]  ;;  %v1292_v14 = vld [vmem:[%s1501_s3 + $0x30] sm:$0xff] }
   0x5   :  { %184 = vperm.xlu0 %1149, %v1249_v6   ;;  %194 = vperm.xlu1 %1150, %v1254_v7   ;;  %v1297_v15 = vld [vmem:[%s1501_s3 + $0x38] sm:$0xff]  ;;  %v23_v16 = vld [vmem:[%s1499_s1 + $0x10] sm:$0xff] }
   0x9   :  { %189 = vperm.xlu0 %1149, %v1265_v9   ;;  %199 = vperm.xlu1 %1150, %v1270_v10  }
   0xb   :  { %1031 = vmatmul.mubr.msk.f32.vlgmr.msra.gmra.mrb[0].mxu0 %vm30_vm0, %v21_v8 }
   0xc   :  { %1033 = vmatprep.mubr.msk.f32.mxu0 %vm1203_vm2, %v1204_v4 }
   0xd   :  { %204 = vperm.xlu0 %1149, %v1275_v11   ;;  %209 = vperm.xlu1 %1150, %v1280_v12  }
   0xf   :  { %1034 = vmatmul.mubr.msk.f32.gmra.mrb[2].mxu0 %vm30_vm0, %v22_v13 }
  0x10   :  { %1036 = vmatprep.mubr.msk.f32.mxu0 %vm1203_vm2, %v1204_v4 }
  0x11   :  { %214 = vperm.xlu0 %1149, %v1292_v14   ;;  %219 = vperm.xlu1 %1150, %v1297_v15  }
  0x13   :  { %1037 = vmatmul.mubr.msk.f32.gmra.mrb[4].mxu0 %vm30_vm0, %v23_v16 }
  0x14   :  { %9 = vsyncpa [#allocation3], 0  ;;  %1039 = vmatprep.mubr.msk.f32.mxu0 %vm1203_vm2, %v1204_v4  ;;  %v24_v17 = vld [vmem:[%s1499_s1 + $0x18] sm:$0xff]  ;;  %v25_v18 = vld [vmem:[%s1499_s1 + $0x20] sm:$0xff]  ;;  %vm394_vm3 = vcmask 523264   ;;  %v1206_v24 = vmov 1  }
  0x15   :  { %v26_v19 = vld [vmem:[%s1499_s1 + $0x28] sm:$0xff]  ;;  %v27_v20 = vld [vmem:[%s1499_s1 + $0x30] sm:$0xff]  ;;  %v28_v21 = vld [vmem:[%s1499_s1 + $0x38] sm:$0xff]  ;;  %1152 = vset.pattern.permute.xlu1 %v1206_v24  ;;  %1151 = vset.pattern.permute.xlu0 %v1206_v24  ;;  %vm902_vm4 = vcmask 130048   ;;  %vm924_vm5 = vcmask 122880  }
  0x16   :  { %v29_v22 = vld [vmem:[%s1499_s1 + $0x40] sm:$0xff]  ;;  %281 = vperm.xlu1 %1152, %v1265_v9   ;;  %276 = vperm.xlu0 %1151, %v1249_v6   ;;  %v1358_v26 = vld [vmem:[%s1501_s3 + $0x48] sm:$0xff]  ;;  %v1365_v27 = vld [vmem:[%s1501_s3 + $0x50] sm:$0xff] }
  0x17   :  { %1040 = vmatmul.mubr.msk.f32.gmra.mrb[6].mxu0 %vm30_vm0, %v24_v17  ;;  %1055 = vmatmul.mubr.msk.f32.vlgmr.msra.gmra.mrb[0].mxu1 %vm30_vm0, %v29_v22  ;;  %v1160_v23 = vld [vmem:[%s1500_s2] sm:$0xff]   ;;  %v1370_v28 = vld [vmem:[%s1501_s3 + $0x58] sm:$0xff]  ;;  %v1382_v30 = vld [vmem:[%s1501_s3 + $0x68] sm:$0xff] }
  0x18   :  { %1042 = vmatprep.mubr.msk.f32.mxu0 %vm1203_vm2, %v1204_v4  ;;  %1065 = vmatprep.mubr.msk.bf16.mxu1 %vm394_vm3, %v1160_v23  ;;  %v1353_v25 = vld [vmem:[%s1501_s3 + $0x40] sm:$0xff]  ;;  %v1389_v31 = vld [vmem:[%s1501_s3 + $0x70] sm:$0xff]  ;;  %v1394_v32 = vld [vmem:[%s1501_s3 + $0x78] sm:$0xff] }
  0x19   :  { %v1377_v29 = vld [vmem:[%s1501_s3 + $0x60] sm:$0xff]  ;;  %v1162_v22 = vld [vmem:[%s1500_s2 + $0x10] sm:$0xff]   ;;  %v1163_v23 = vld [vmem:[%s1500_s2 + $0x18] sm:$0xff]  }
  0x1a   :  { %286 = vperm.xlu1 %1152, %v1254_v7   ;;  %291 = vperm.xlu0 %1151, %v1270_v10   ;;  %v1164_v24 = vld [vmem:[%s1500_s2 + $0x20] sm:$0xff]  }
  0x1b   :  { %1043 = vmatmul.mubr.msk.f32.gmra.mrb[8].mxu0 %vm30_vm0, %v25_v18 }
  0x1c   :  { %1045 = vmatprep.mubr.msk.f32.mxu0 %vm1203_vm2, %v1204_v4 }
  0x1e   :  { %296 = vperm.xlu1 %1152, %v1275_v11   ;;  %301 = vperm.xlu0 %1151, %v1280_v12  }
  0x1f   :  { %1046 = vmatmul.mubr.msk.f32.gmra.mrb[10].mxu0 %vm30_vm0, %v26_v19 }
  0x20   :  { %1048 = vmatprep.mubr.msk.f32.mxu0 %vm1203_vm2, %v1204_v4 }
  0x22   :  { %306 = vperm.xlu1 %1152, %v1292_v14   ;;  %311 = vperm.xlu0 %1151, %v1297_v15  }
  0x23   :  { %1049 = vmatmul.mubr.msk.f32.gmra.mrb[12].mxu0 %vm30_vm0, %v27_v20 }
  0x24   :  { %1051 = vmatprep.mubr.msk.f32.mxu0 %vm1203_vm2, %v1204_v4 }
  0x26   :  { %316 = vperm.xlu1 %1152, %v1353_v25   ;;  %321 = vperm.xlu0 %1151, %v1358_v26  }
  0x27   :  { %1052 = vmatmul.mubr.msk.f32.gmra.mrb[14].mxu0 %vm30_vm0, %v28_v21  ;;  %v1161_v21 = vld [vmem:[%s1500_s2 + $0x8] sm:$0xff]  }
  0x2a   :  { %326 = vperm.xlu1 %1152, %v1365_v27   ;;  %331 = vperm.xlu0 %1151, %v1370_v28  }
  0x2e   :  { %336 = vperm.xlu1 %1152, %v1377_v29   ;;  %341 = vperm.xlu0 %1151, %v1382_v30  }
  0x32   :  { %346 = vperm.xlu1 %1152, %v1389_v31   ;;  %351 = vperm.xlu0 %1151, %v1394_v32  }
  0x84   :  { %v185_v33 = vpop.permute.xlu0 %184  ;;  %v195_v41 = vpop.permute.xlu1 %194 }
  0x88   :  { %v190_v36 = vpop.permute.xlu0 %189  ;;  %v200_v48 = vpop.permute.xlu1 %199 }
  0x8c   :  { %v205_v57 = vpop.permute.xlu0 %204  ;;  %v210_v59 = vpop.permute.xlu1 %209 }
  0x90   :  { %v215_v4 = vpop.permute.xlu0 %214  ;;  %v220_v8 = vpop.permute.xlu1 %219 }
  0xde   :  { %v130_v34 = vpop.f32.mrb[0].mxu0 }
  0xdf   :  { %v1032_v35 = vpop.f32.mrb[1].mxu0  ;;  %v222_v37 = vadd.f32 %v185_v33, %v130_v34  ;;  %v1165_v33 = vld [vmem:[%s1500_s2 + $0x28] sm:$0xff]   ;;  %v1166_v34 = vld [vmem:[%s1500_s2 + $0x30] sm:$0xff]  }
  0xe0   :  { %v1167_v35 = vld [vmem:[%s1500_s2 + $0x38] sm:$0xff]  }
  0xe1   :  { %v230_v42 = vmax.f32 %v222_v37, 0.0 }
  0xe2   :  { %v135_v38 = vpop.f32.mrb[2].mxu0 }
  0xe3   :  { %v223_v39 = vadd.f32 %v190_v36, %v135_v38  ;;  %v1035_v40 = vpop.f32.mrb[3].mxu0  ;;  %v1168_v38 = vld [vmem:[%s1500_s2 + $0x40] sm:$0xff]  }
  0xe4   :  { %1097 = vmatprep.mubr.bf16.mxu0 %v1168_v38 }
  0xe5   :  { %v231_v43 = vmax.f32 %v223_v39, 0.0  ;;  %v1207_v39 = vmov 2  }
  0xe6   :  { %v140_v44 = vpop.f32.mrb[4].mxu0  ;;  %1153 = vset.pattern.permute.xlu1 %v1207_v39  ;;  %1154 = vset.pattern.permute.xlu0 %v1207_v39 }
  0xe7   :  { %v238_v45 = vpack.c.bf16 %v231_v43, %v230_v42  ;;  %v1038_v46 = vpop.f32.mrb[5].mxu0  ;;  %v224_v47 = vadd.f32 %v195_v41, %v140_v44  ;;  %557 = vperm.xlu1 %1153, %v1249_v6   ;;  %561 = vperm.xlu0 %1154, %v1265_v9  }
  0xe9   :  { %1057 = vmatprep.subr.bf16.mxu1 %v238_v45  ;;  %v232_v52 = vmax.f32 %v224_v47, 0.0 }
  0xea   :  { %v145_v49 = vpop.f32.mrb[6].mxu0  ;;  %1058 = vmatpush3.bf16.msra.mxu1 %v238_v45  ;;  %v1426_v36 = vpop.f32.mrb[0].mxu1 }
  0xeb   :  { %v225_v50 = vadd.f32 %v200_v48, %v145_v49  ;;  %v1041_v51 = vpop.f32.mrb[7].mxu0  ;;  %v1056_v37 = vpop.f32.mrb[1].mxu1  ;;  %565 = vperm.xlu1 %1153, %v1254_v7   ;;  %573 = vperm.xlu0 %1154, %v1275_v11  }
  0xec   :  { %v282_v11 = vpop.permute.xlu1 %281 }
  0xed   :  { %v233_v53 = vmax.f32 %v225_v50, 0.0 }
  0xee   :  { %v150_v54 = vpop.f32.mrb[8].mxu0 }
  0xef   :  { %v239_v55 = vpack.c.bf16 %v233_v53, %v232_v52  ;;  %v1044_v56 = vpop.f32.mrb[9].mxu0  ;;  %v226_v58 = vadd.f32 %v205_v57, %v150_v54  ;;  %569 = vperm.xlu1 %1153, %v1270_v10   ;;  %581 = vperm.xlu0 %1154, %v1292_v14  }
  0xf0   :  { %v287_v14 = vpop.permute.xlu1 %286 }
  0xf1   :  { %1059 = vmatprep.subr.bf16.mxu1 %v239_v55  ;;  %v234_v63 = vmax.f32 %v226_v58, 0.0 }
  0xf2   :  { %v155_v60 = vpop.f32.mrb[10].mxu0  ;;  %1060 = vmatpush3.bf16.msra.mxu1 %v239_v55 }
  0xf3   :  { %v227_v61 = vadd.f32 %v210_v59, %v155_v60  ;;  %v1047_v62 = vpop.f32.mrb[11].mxu0  ;;  %577 = vperm.xlu1 %1153, %v1280_v12   ;;  %589 = vperm.xlu0 %1154, %v1353_v25   ;;  %v277_v12 = vpop.permute.xlu0 %276 }
  0xf4   :  { %v297_v40 = vpop.permute.xlu1 %296 }
  0xf5   :  { %v235_v0 = vmax.f32 %v227_v61, 0.0 }
  0xf6   :  { %v160_v1 = vpop.f32.mrb[12].mxu0 }
  0xf7   :  { %v240_v2 = vpack.c.bf16 %v235_v0, %v234_v63  ;;  %v1050_v3 = vpop.f32.mrb[13].mxu0  ;;  %v228_v5 = vadd.f32 %v215_v4, %v160_v1  ;;  %585 = vperm.xlu1 %1153, %v1297_v15   ;;  %597 = vperm.xlu0 %1154, %v1365_v27   ;;  %v292_v25 = vpop.permute.xlu0 %291 }
  0xf8   :  { %v307_v41 = vpop.permute.xlu1 %306 }
  0xf9   :  { %1061 = vmatprep.subr.bf16.mxu1 %v240_v2  ;;  %v236_v18 = vmax.f32 %v228_v5, 0.0 }
  0xfa   :  { %v165_v13 = vpop.f32.mrb[14].mxu0  ;;  %1062 = vmatpush3.bf16.msra.mxu1 %v240_v2 }
  0xfb   :  { %v229_v16 = vadd.f32 %v220_v8, %v165_v13  ;;  %v1053_v17 = vpop.f32.mrb[15].mxu0  ;;  %593 = vperm.xlu1 %1153, %v1358_v26   ;;  %605 = vperm.xlu0 %1154, %v1377_v29   ;;  %v302_v15 = vpop.permute.xlu0 %301 }
  0xfc   :  { %v317_v47 = vpop.permute.xlu1 %316 }
  0xfd   :  { %v237_v19 = vmax.f32 %v229_v16, 0.0 }
  0xff   :  { %v241_v20 = vpack.c.bf16 %v237_v19, %v236_v18  ;;  %601 = vperm.xlu1 %1153, %v1370_v28   ;;  %613 = vperm.xlu0 %1154, %v1389_v31   ;;  %v312_v43 = vpop.permute.xlu0 %311 }
 0x100   :  { %v327_v59 = vpop.permute.xlu1 %326 }
 0x101   :  { %1063 = vmatprep.subr.bf16.mxu1 %v241_v20 }
 0x102   :  { %1064 = vmatpush3.bf16.msra.mxu1 %v241_v20 }
 0x103   :  { %609 = vperm.xlu1 %1153, %v1382_v30   ;;  %v322_v50 = vpop.permute.xlu0 %321 }
 0x104   :  { %v337_v13 = vpop.permute.xlu1 %336 }
 0x105   :  { %1066 = vmatmul.mubr.msk.bf16.vlgmr.msra.gmra.mrb[4].mxu1 %vm394_vm3, %v1161_v21 }
 0x106   :  { %1069 = vmatprep.mubr.msk.bf16.mxu1 %vm394_vm3, %v1162_v22 }
 0x107   :  { %617 = vperm.xlu1 %1153, %v1394_v32   ;;  %v332_v63 = vpop.permute.xlu0 %331 }
 0x10b   :  { %v342_v20 = vpop.permute.xlu0 %341 }
 0x10d   :  { %1070 = vmatmul.mubr.msk.bf16.gmra.mrb[8].mxu1 %vm394_vm3, %v1163_v23 }
 0x10e   :  { %1073 = vmatprep.mubr.msk.bf16.mxu1 %vm394_vm3, %v1164_v24 }
 0x115   :  { %1074 = vmatmul.mubr.msk.bf16.gmra.mrb[12].mxu1 %vm394_vm3, %v1165_v33 }
 0x116   :  { %1077 = vmatprep.mubr.msk.bf16.mxu1 %vm394_vm3, %v1166_v34 }
 0x11d   :  { %1078 = vmatmul.mubr.msk.bf16.gmra.mrb[16].mxu1 %vm394_vm3, %v1167_v35  ;;  %v347_v35 = vpop.permute.xlu1 %346 }
 0x1d8   :  { %v1067_v27 = vpop.f32.mrb[4].mxu1 }
 0x1d9   :  { %v462_v42 = vadd.f32 %v1067_v27, %v287_v14  ;;  %v453_v26 = vpop.f32.mrb[5].mxu1 }
 0x1da   :  { %v454_v29 = vadd.f32 %v453_v26, %v277_v12  ;;  %v1068_v44 = vpop.f32.mrb[6].mxu1  ;;  %v352_v12 = vpop.permute.xlu0 %351 }
 0x1db   :  { %v465_v28 = vadd.f32 %v1068_v44, %v292_v25  ;;  %v456_v45 = vpop.f32.mrb[7].mxu1  ;;  %v518_v46 = vmax.f32 %v462_v42, 0.0 }
 0x1dc   :  { %v457_v31 = vadd.f32 %v456_v45, %v282_v11  ;;  %v516_v32 = vmax.f32 %v454_v29, 0.0  ;;  %v1170_v45 = vld [vmem:[%s1500_s2 + $0x50] sm:$0xff]  }
 0x1dd   :  { %v519_v30 = vmax.f32 %v465_v28, 0.0  ;;  %v1169_v28 = vld [vmem:[%s1500_s2 + $0x48] sm:$0xff]  }
 0x1de   :  { %v517_v48 = vmax.f32 %v457_v31, 0.0  ;;  %v1171_v31 = vld [vmem:[%s1500_s2 + $0x58] sm:$0xff]  }
 0x1df   :  { %v533_v49 = vpack.c.bf16 %v519_v30, %v518_v46  ;;  %v1172_v46 = vld [vmem:[%s1500_s2 + $0x60] sm:$0xff]   ;;  %v1173_v30 = vld [vmem:[%s1500_s2 + $0x68] sm:$0xff]  }
 0x1e0   :  { %v532_v51 = vpack.c.bf16 %v517_v48, %v516_v32  ;;  %v1071_v52 = vpop.f32.mrb[8].mxu1  ;;  %v1175_v32 = vld [vmem:[%s1500_s2 + $0x78] sm:$0xff]   ;;  %v1176_v48 = vld [vmem:[%s1500_s2 + $0x80] sm:$0xff]  }
 0x1e1   :  { %v478_v53 = vadd.f32 %v1071_v52, %v307_v41  ;;  %v469_v54 = vpop.f32.mrb[9].mxu1  ;;  %1129 = vmatprep.mubr.bf16.mxu1 %v1176_v48  ;;  %v1210_v52 = vmov 5  }
 0x1e2   :  { %v470_v55 = vadd.f32 %v469_v54, %v297_v40  ;;  %v1072_v56 = vpop.f32.mrb[10].mxu1  ;;  %1081 = vmatprep.subr.bf16.mxu0 %v532_v51 }
 0x1e3   :  { %v481_v57 = vadd.f32 %v1072_v56, %v312_v43  ;;  %v472_v58 = vpop.f32.mrb[11].mxu1  ;;  %1082 = vmatpush3.bf16.msra.mxu0 %v532_v51  ;;  %v522_v61 = vmax.f32 %v478_v53, 0.0  ;;  %v917_v51 = vld [vmem:[%s1501_s3] sm:$0x1]  ;;  %v558_v53 = vpop.permute.xlu1 %557 }
 0x1e4   :  { %v473_v60 = vadd.f32 %v472_v58, %v302_v15  ;;  %1083 = vmatprep.subr.bf16.mxu0 %v533_v49  ;;  %v520_v0 = vmax.f32 %v470_v55, 0.0  ;;  %v562_v55 = vpop.permute.xlu0 %561 }
 0x1e5   :  { %v523_v62 = vmax.f32 %v481_v57, 0.0 }
 0x1e6   :  { %v521_v1 = vmax.f32 %v473_v60, 0.0 }
 0x1e7   :  { %v535_v2 = vpack.c.bf16 %v523_v62, %v522_v61  ;;  %1084 = vmatpush3.bf16.msra.mxu0 %v533_v49  ;;  %v1208_v49 = vmov 3   ;;  %v566_v54 = vpop.permute.xlu1 %565 }
 0x1e8   :  { %v534_v3 = vpack.c.bf16 %v521_v1, %v520_v0  ;;  %v1075_v4 = vpop.f32.mrb[12].mxu1  ;;  %1156 = vset.pattern.permute.xlu1 %v1208_v49  ;;  %1155 = vset.pattern.permute.xlu0 %v1208_v49  ;;  %v574_v57 = vpop.permute.xlu0 %573 }
 0x1e9   :  { %v494_v5 = vadd.f32 %v1075_v4, %v327_v59  ;;  %v485_v8 = vpop.f32.mrb[13].mxu1  ;;  %804 = vperm.xlu1 %1156, %v1265_v9   ;;  %799 = vperm.xlu0 %1155, %v1249_v6  }
 0x1ea   :  { %v486_v16 = vadd.f32 %v485_v8, %v317_v47  ;;  %v1076_v17 = vpop.f32.mrb[14].mxu1  ;;  %1085 = vmatprep.subr.bf16.mxu0 %v534_v3  ;;  %v1174_v47 = vld [vmem:[%s1500_s2 + $0x70] sm:$0xff]  }
 0x1eb   :  { %v497_v18 = vadd.f32 %v1076_v17, %v332_v63  ;;  %v488_v19 = vpop.f32.mrb[15].mxu1  ;;  %1086 = vmatpush3.bf16.msra.mxu0 %v534_v3  ;;  %v526_v22 = vmax.f32 %v494_v5, 0.0  ;;  %v570_v56 = vpop.permute.xlu1 %569 }
 0x1ec   :  { %v489_v21 = vadd.f32 %v488_v19, %v322_v50  ;;  %1087 = vmatprep.subr.bf16.mxu0 %v535_v2  ;;  %v524_v24 = vmax.f32 %v486_v16, 0.0  ;;  %v1209_v50 = vmov 4  }
 0x1ed   :  { %v527_v23 = vmax.f32 %v497_v18, 0.0  ;;  %809 = vperm.xlu1 %1156, %v1254_v7   ;;  %814 = vperm.xlu0 %1155, %v1270_v10  }
 0x1ee   :  { %v525_v33 = vmax.f32 %v489_v21, 0.0 }
 0x1ef   :  { %v537_v34 = vpack.c.bf16 %v527_v23, %v526_v22  ;;  %1088 = vmatpush3.bf16.msra.mxu0 %v535_v2  ;;  %v578_v58 = vpop.permute.xlu1 %577 }
 0x1f0   :  { %v536_v37 = vpack.c.bf16 %v525_v33, %v524_v24  ;;  %v1079_v38 = vpop.f32.mrb[16].mxu1 }
 0x1f1   :  { %v510_v39 = vadd.f32 %v1079_v38, %v347_v35  ;;  %v501_v11 = vpop.f32.mrb[17].mxu1  ;;  %1157 = vset.pattern.permute.xlu1 %v1209_v50  ;;  %1158 = vset.pattern.permute.xlu0 %v1209_v50 }
 0x1f2   :  { %v502_v14 = vadd.f32 %v501_v11, %v337_v13  ;;  %v1080_v25 = vpop.f32.mrb[18].mxu1  ;;  %1089 = vmatprep.subr.bf16.mxu0 %v536_v37  ;;  %883 = vperm.xlu1 %1157, %v1249_v6   ;;  %v582_v6 = vpop.permute.xlu0 %581 }
 0x1f3   :  { %v513_v40 = vadd.f32 %v1080_v25, %v352_v12  ;;  %v504_v15 = vpop.f32.mrb[19].mxu1  ;;  %1090 = vmatpush3.bf16.msra.mxu0 %v536_v37  ;;  %v530_v27 = vmax.f32 %v510_v39, 0.0  ;;  %887 = vperm.xlu0 %1158, %v1265_v9   ;;  %v586_v61 = vpop.permute.xlu1 %585 }
 0x1f4   :  { %v505_v41 = vadd.f32 %v504_v15, %v342_v20  ;;  %1091 = vmatprep.subr.bf16.mxu0 %v537_v34  ;;  %v528_v26 = vmax.f32 %v502_v14, 0.0 }
 0x1f5   :  { %v531_v42 = vmax.f32 %v513_v40, 0.0 }
 0x1f6   :  { %v529_v43 = vmax.f32 %v505_v41, 0.0  ;;  %891 = vperm.xlu1 %1157, %v1254_v7   ;;  %v590_v4 = vpop.permute.xlu0 %589 }
 0x1f7   :  { %v539_v29 = vpack.c.bf16 %v531_v42, %v530_v27  ;;  %1092 = vmatpush3.bf16.msra.mxu0 %v537_v34  ;;  %1159 = vset.pattern.permute.xlu0 %v1210_v52  ;;  %v594_v13 = vpop.permute.xlu1 %593 }
 0x1f8   :  { %v538_v44 = vpack.c.bf16 %v529_v43, %v528_v26  ;;  %920 = vperm.xlu0 %1159, %v917_v51  }
 0x1fa   :  { %1093 = vmatprep.subr.bf16.mxu0 %v538_v44  ;;  %895 = vperm.xlu1 %1157, %v1270_v10   ;;  %v598_v24 = vpop.permute.xlu0 %597 }
 0x1fb   :  { %1094 = vmatpush3.bf16.msra.mxu0 %v538_v44  ;;  %v602_v37 = vpop.permute.xlu1 %601 }
 0x1fc   :  { %1095 = vmatprep.subr.bf16.mxu0 %v539_v29 }
 0x1fe   :  { %v606_v15 = vpop.permute.xlu0 %605 }
 0x1ff   :  { %1096 = vmatpush3.bf16.msra.mxu0 %v539_v29  ;;  %v610_v43 = vpop.permute.xlu1 %609 }
 0x202   :  { %1098 = vmatmul.mubr.bf16.vlgmr.msra.gmra.mrb[16].mxu0 %v1169_v28 }
 0x203   :  { %1101 = vmatprep.mubr.bf16.mxu0 %v1170_v45  ;;  %v618_v50 = vpop.permute.xlu1 %617 }
 0x20a   :  { %1102 = vmatmul.mubr.bf16.gmra.mrb[20].mxu0 %v1171_v31 }
 0x20b   :  { %1105 = vmatprep.mubr.bf16.mxu0 %v1172_v46 }
 0x212   :  { %1106 = vmatmul.mubr.bf16.gmra.mrb[24].mxu0 %v1173_v30  ;;  %v614_v30 = vpop.permute.xlu0 %613 }
 0x213   :  { %1109 = vmatprep.mubr.bf16.mxu0 %v1174_v47 }
 0x21a   :  { %1110 = vmatmul.mubr.bf16.gmra.mrb[28].mxu0 %v1175_v32 }
 0x2d5   :  { %v1099_v59 = vpop.f32.mrb[16].mxu0 }
 0x2d6   :  { %v711_v9 = vadd.f32 %v1099_v59, %v566_v54  ;;  %v702_v60 = vpop.f32.mrb[17].mxu0 }
 0x2d7   :  { %v703_v62 = vadd.f32 %v702_v60, %v558_v53  ;;  %v1100_v63 = vpop.f32.mrb[18].mxu0  ;;  %v1177_v60 = vld [vmem:[%s1500_s2 + $0x88] sm:$0xff]   ;;  %s1211_s2 = smov [#allocation2]  }
 0x2d8   :  { %v714_v0 = vadd.f32 %v1100_v63, %v570_v56  ;;  %v705_v7 = vpop.f32.mrb[19].mxu0  ;;  %v767_v2 = vmax.f32 %v711_v9, 0.0  ;;  %v800_v63 = vpop.permute.xlu0 %799  ;;  %s932_s22 = sshll.u32 %s1211_s2, 4  ;;  %s933_s22 = int_to_ptr.vmem [resolvable:$true] %s932_s22 }
 0x2d9   :  { %v706_v1 = vadd.f32 %v705_v7, %v562_v55  ;;  %v765_v10 = vmax.f32 %v703_v62, 0.0  ;;  %s1178_s23 = scalar_lea.vmem %s933_s22, 16  ;;  %s1182_s24 = scalar_lea.vmem %s933_s22, 32 }
 0x2da   :  { %v768_v3 = vmax.f32 %v714_v0, 0.0  ;;  %p1179_p0 = scmp.ne.s32.totalorder %s933_s22, %s1178_s23  ;;  %p1183_p1 = scmp.lt.s32.totalorder %s933_s22, %s933_s22 }
 0x2db   :  { %v766_v5 = vmax.f32 %v706_v1, 0.0  ;;  %p1184_p2 = scmp.lt.s32.totalorder %s1182_s24, %s1178_s23 }
 0x2dc   :  { %v782_v8 = vpack.c.bf16 %v768_v3, %v767_v2  ;;  %v815_v1 = vpop.permute.xlu0 %814 }
 0x2dd   :  { %v781_v16 = vpack.c.bf16 %v766_v5, %v765_v10  ;;  %v1103_v17 = vpop.f32.mrb[20].mxu0  ;;  %p1185_p3 = por %p1184_p2, %p1183_p1 }
 0x2de   :  { %v727_v18 = vadd.f32 %v1103_v17, %v582_v6  ;;  %v718_v19 = vpop.f32.mrb[21].mxu0 }
 0x2df   :  { %v719_v20 = vadd.f32 %v718_v19, %v574_v57  ;;  %v1104_v21 = vpop.f32.mrb[22].mxu0  ;;  %1113 = vmatprep.subr.bf16.mxu1 %v781_v16  ;;  %p1186_p4 = pnand %p1185_p3, %p1179_p0 }
 0x2e0   :  { %v730_v22 = vadd.f32 %v1104_v21, %v586_v61  ;;  %v721_v23 = vpop.f32.mrb[23].mxu0  ;;  %1114 = vmatpush3.bf16.msra.mxu1 %v781_v16  ;;  %v771_v34 = vmax.f32 %v727_v18, 0.0  ;;  %v805_v61 = vpop.permute.xlu1 %804 }
 0x2e1   :  { %v722_v33 = vadd.f32 %v721_v23, %v578_v58  ;;  %1115 = vmatprep.subr.bf16.mxu1 %v782_v8  ;;  %v769_v38 = vmax.f32 %v719_v20, 0.0  ;;  %v888_v19 = vpop.permute.xlu0 %887 }
 0x2e2   :  { %v772_v35 = vmax.f32 %v730_v22, 0.0 }
 0x2e3   :  { %v770_v39 = vmax.f32 %v722_v33, 0.0 }
 0x2e4   :  { %v784_v11 = vpack.c.bf16 %v772_v35, %v771_v34  ;;  %1116 = vmatpush3.bf16.msra.mxu1 %v782_v8  ;;  %v810_v62 = vpop.permute.xlu1 %809 }
 0x2e5   :  { %v783_v12 = vpack.c.bf16 %v770_v39, %v769_v38  ;;  %v1107_v14 = vpop.f32.mrb[24].mxu0 }
 0x2e6   :  { %v743_v25 = vadd.f32 %v1107_v14, %v598_v24  ;;  %v734_v40 = vpop.f32.mrb[25].mxu0 }
 0x2e7   :  { %v735_v41 = vadd.f32 %v734_v40, %v590_v4  ;;  %v1108_v27 = vpop.f32.mrb[26].mxu0  ;;  %1117 = vmatprep.subr.bf16.mxu1 %v783_v12 }
 0x2e8   :  { %v746_v42 = vadd.f32 %v1108_v27, %v602_v37  ;;  %v737_v26 = vpop.f32.mrb[27].mxu0  ;;  %1118 = vmatpush3.bf16.msra.mxu1 %v783_v12  ;;  %v775_v44 = vmax.f32 %v743_v25, 0.0  ;;  %v884_v0 = vpop.permute.xlu1 %883 }
 0x2e9   :  { %v738_v29 = vadd.f32 %v737_v26, %v594_v13  ;;  %1119 = vmatprep.subr.bf16.mxu1 %v784_v11  ;;  %v773_v45 = vmax.f32 %v735_v41, 0.0  ;;  %v921_v26 = vpop.permute.xlu0 %920 }
 0x2ea   :  { %v776_v28 = vmax.f32 %v746_v42, 0.0 }
 0x2eb   :  { %v774_v31 = vmax.f32 %v738_v29, 0.0 }
 0x2ec   :  { %v786_v46 = vpack.c.bf16 %v776_v28, %v775_v44  ;;  %1120 = vmatpush3.bf16.msra.mxu1 %v784_v11  ;;  %v892_v5 = vpop.permute.xlu1 %891 }
 0x2ed   :  { %v785_v47 = vpack.c.bf16 %v774_v31, %v773_v45  ;;  %v1111_v32 = vpop.f32.mrb[28].mxu0 }
 0x2ee   :  { %v759_v48 = vadd.f32 %v1111_v32, %v614_v30  ;;  %v750_v49 = vpop.f32.mrb[29].mxu0 }
 0x2ef   :  { %v751_v51 = vadd.f32 %v750_v49, %v606_v15  ;;  %v1112_v52 = vpop.f32.mrb[30].mxu0  ;;  %1121 = vmatprep.subr.bf16.mxu1 %v785_v47 }
 0x2f0   :  { %v762_v53 = vadd.f32 %v1112_v52, %v618_v50  ;;  %v753_v54 = vpop.f32.mrb[31].mxu0  ;;  %1122 = vmatpush3.bf16.msra.mxu1 %v785_v47  ;;  %v779_v56 = vmax.f32 %v759_v48, 0.0  ;;  %v896_v33 = vpop.permute.xlu1 %895 }
 0x2f1   :  { %v754_v55 = vadd.f32 %v753_v54, %v610_v43  ;;  %1123 = vmatprep.subr.bf16.mxu1 %v786_v46  ;;  %v777_v58 = vmax.f32 %v751_v51, 0.0 }
 0x2f2   :  { %v780_v57 = vmax.f32 %v762_v53, 0.0 }
 0x2f3   :  { %v778_v6 = vmax.f32 %v754_v55, 0.0 }
 0x2f4   :  { %v788_v59 = vpack.c.bf16 %v780_v57, %v779_v56  ;;  %1124 = vmatpush3.bf16.msra.mxu1 %v786_v46 }
 0x2f5   :  { %v787_v9 = vpack.c.bf16 %v778_v6, %v777_v58 }
 0x2f7   :  { %1125 = vmatprep.subr.bf16.mxu1 %v787_v9 }
 0x2f8   :  { %1126 = vmatpush3.bf16.msra.mxu1 %v787_v9 }
 0x2f9   :  { %1127 = vmatprep.subr.bf16.mxu1 %v788_v59 }
 0x2fc   :  { %1128 = vmatpush3.bf16.msra.mxu1 %v788_v59 }
 0x2ff   :  { %1130 = vmatmul.mubr.bf16.vlgmr.msra.gmra.mrb[20].mxu1 %v1177_v60 }
 0x3d2   :  { %v1131_v7 = vpop.f32.mrb[20].mxu1 }
 0x3d3   :  { %v872_v2 = vadd.f32 %v1131_v7, %v810_v62  ;;  %v863_v3 = vpop.f32.mrb[21].mxu1 }
 0x3d4   :  { %v864_v4 = vadd.f32 %v863_v3, %v800_v63  ;;  %v1132_v10 = vpop.f32.mrb[22].mxu1 }
 0x3d5   :  { %v875_v8 = vadd.f32 %v1132_v10, %v815_v1  ;;  %v866_v13 = vpop.f32.mrb[23].mxu1  ;;  %v880_v16 = vmax.f32 %v872_v2, 0.0 }
 0x3d6   :  { %v878_v17 = vmax.f32 %v864_v4, 0.0  ;;  %v867_v18 = vadd.f32 %v866_v13, %v805_v61 }
 0x3d7   :  { %v881_v21 = vmax.f32 %v875_v8, 0.0  ;;  %v900_v23 = vmul.f32 %v892_v5, %v880_v16 }
 0x3d8   :  { %v898_v20 = vmul.f32 %v884_v0, %v878_v17  ;;  %v879_v22 = vmax.f32 %v867_v18, 0.0 }
 0x3d9   :  { %v901_v34 = vmul.f32 %v896_v33, %v881_v21  ;;  %v906_v39 = vsel %vm902_vm4, %v900_v23, 0.0 }
 0x3da   :  { %v899_v24 = vmul.f32 %v888_v19, %v879_v22  ;;  %v903_v35 = vsel %vm902_vm4, %v898_v20, 0.0 }
 0x3db   :  { %v908_v12 = vsel %vm902_vm4, %v901_v34, 0.0 }
 0x3dc   :  { %v904_v37 = vsel %vm902_vm4, %v899_v24, 0.0 }
 0x3dd   :  { %v905_v38 = vadd.f32 %v904_v37, %v903_v35 }
 0x3df   :  { %v907_v11 = vadd.f32 %v906_v39, %v905_v38 }
 0x3e1   :  { %v909_v14 = vadd.f32 %v908_v12, %v907_v11 }
 0x3e3   :  { %v910_v25 = vrot.slane %v909_v14, 4 }
 0x3e5   :  { %v911_v40 = vadd.f32 %v910_v25, %v909_v14 }
 0x3e7   :  { %v912_v15 = vrot.slane %v911_v40, 2 }
 0x3e9   :  { %v913_v41 = vadd.f32 %v912_v15, %v911_v40 }
 0x3eb   :  { %v914_v27 = vrot.slane %v913_v41, 1 }
 0x3ed   :  { %v915_v42 = vadd.f32 %v914_v27, %v913_v41 }
 0x3ef   :  { %v916_v43 = vadd.f32 %v915_v42, %v1426_v36 }
 0x3f1   :  { %v923_v29 = vadd.f32 %v921_v26, %v916_v43 }
 0x3f3   :  { %925 = vst.msk [vmem:[#allocation2] sm:$0x1] %vm924_vm5, %v923_v29 }
 0x3f4   :  { %1189 = shalt.err (!%p1186_p4)
}
 0x3f5   :  { %s1190_s1 = scalar_lea.hbm %s1502_s4, 16 }
 0x3f6   :  { %p1191_p5 = scmp.ne.s32.totalorder %s1502_s4, %s1190_s1  ;;  %p1194_p6 = scmp.lt.u32.totalorder %s1190_s1, %s1502_s4 }
 0x3f8   :  { %p1196_p7 = pnand %p1194_p6, %p1191_p5 }
 0x3fa   :  { %1199 = shalt.err (!%p1196_p7)
}
 0x3fb   :  { %935 = dma.vmem_to_hbm [thread:$0]  %s933_s22, 16, %s1502_s4, [#allocation3]  }
 0x3fc   :  { %1200 = dma.done.wait [#allocation3], 16  }
 0x3fd   :  { %1201 = vsyncadd [#allocation3], 4294967280 }
 0x3fe   :  { %939 = vsyncpa [#allocation3], 1 }

</bundles_post_ra>
